<compile_context>
chip_gen: v6e
topology: v6e:2x2x1
jax: 0.10.0
libtpu: 0.0.40
codegen_flags: <defaults>
</compile_context>

<pallas_src>
import jax
import jax.numpy as jnp
from jax.experimental import pallas as pl
from jax.experimental.pallas import tpu as pltpu

IN_DIM = 400
HID_DIM = 50
OUT_DIM = 30

HID_PAD = 128   # hidden dim padded to a full lane group
OUT_PAD = 128   # output dim padded so the store is lane-dense


def _round_up(n, m):
    return ((n + m - 1) // m) * m


def _cdiv(n, m):
    return (n + m - 1) // m


def mlp_kernel(x_ref, w1_ref, b1_ref, w2_ref, b2_ref, o_ref):
    # Two MXU matmuls + EUP sigmoids, fully fused on one batch tile.
    h = jnp.dot(x_ref[...], w1_ref[...], preferred_element_type=jnp.float32)
    h = jax.nn.sigmoid(h + b1_ref[...])                        # Sigmoid 1 (EUP)
    y = jnp.dot(h.astype(w2_ref.dtype), w2_ref[...],
                preferred_element_type=jnp.float32)
    o_ref[...] = jax.nn.sigmoid(y + b2_ref[...]).astype(o_ref.dtype)  # Sigmoid 2


def pad_params(w1, b1, w2, b2, *, dtype=jnp.float32):
    """Zero-pad params to TPU-friendly widths ONCE (at init time, not per call).

    w1: [400, 50], b1: [1, 50] or [50], w2: [50, 30], b2: [1, 30] or [30].
    Returns (w1p [400,128] dtype, b1p [1,128] f32, w2p [128,128] dtype,
             b2p [1,128] f32).  ~0.3 MiB total, stays VMEM-resident in-kernel.
    """
    w1 = jnp.asarray(w1, jnp.float32).reshape(IN_DIM, HID_DIM)
    b1 = jnp.asarray(b1, jnp.float32).reshape(1, HID_DIM)
    w2 = jnp.asarray(w2, jnp.float32).reshape(HID_DIM, OUT_DIM)
    b2 = jnp.asarray(b2, jnp.float32).reshape(1, OUT_DIM)
    w1p = jnp.zeros((IN_DIM, HID_PAD), dtype).at[:, :HID_DIM].set(w1.astype(dtype))
    b1p = jnp.zeros((1, HID_PAD), jnp.float32).at[:, :HID_DIM].set(b1)
    w2p = jnp.zeros((HID_PAD, OUT_PAD), dtype).at[:HID_DIM, :OUT_DIM].set(w2.astype(dtype))
    b2p = jnp.zeros((1, OUT_PAD), jnp.float32).at[:, :OUT_DIM].set(b2)
    return w1p, b1p, w2p, b2p


def _choose_batch_tile(B, block_b):
    """Batch tile: multiple of 8, <= block_b, aiming for >=4 grid steps (so
    v7x's two TensorCores both get work) without dropping below the ~512-row
    HBM-roofline plateau, and never larger than the largest multiple of 8
    that fits in B (so only the standard short last block is ragged)."""
    if B <= 8:
        return B                      # one exact block (== full dim, legal)
    tb = min(block_b, max(512, _round_up(_cdiv(B, 4), 8)))
    return min(tb, (B // 8) * 8)


def mlp_forward(x, w1p, b1p, w2p, b2p, *, block_b=1024):
    """x: [B, 400]; padded params from pad_params(); returns [B, 30] f32."""
    B = x.shape[0]
    if x.dtype != w1p.dtype:
        x = x.astype(w1p.dtype)       # bf16 path: halve the dominant HBM stream

    tb = _choose_batch_tile(B, block_b)
    grid = (pl.cdiv(B, tb),)          # ragged last block handled by Pallas

    cost = pl.CostEstimate(
        flops=2 * B * (IN_DIM * HID_PAD + HID_PAD * OUT_PAD),
        transcendentals=B * (HID_PAD + OUT_PAD),
        bytes_accessed=(B * IN_DIM * x.dtype.itemsize
                        + B * OUT_PAD * 4
                        + (IN_DIM * HID_PAD + HID_PAD * OUT_PAD) * w1p.dtype.itemsize
                        + (HID_PAD + OUT_PAD) * 4),
    )

    out_padded = pl.pallas_call(
        mlp_kernel,
        out_shape=jax.ShapeDtypeStruct((B, OUT_PAD), jnp.float32),
        grid=grid,
        in_specs=[
            pl.BlockSpec((tb, IN_DIM), lambda i: (i, 0)),        # x tile (streamed)
            pl.BlockSpec((IN_DIM, HID_PAD), lambda i: (0, 0)),   # W1 (VMEM-resident)
            pl.BlockSpec((1, HID_PAD), lambda i: (0, 0)),        # b1 (resident)
            pl.BlockSpec((HID_PAD, OUT_PAD), lambda i: (0, 0)),  # W2 (resident)
            pl.BlockSpec((1, OUT_PAD), lambda i: (0, 0)),        # b2 (resident)
        ],
        out_specs=pl.BlockSpec((tb, OUT_PAD), lambda i: (i, 0)),
        compiler_params=pltpu.CompilerParams(
            dimension_semantics=("parallel",),   # megacore sharding on v7x
        ),
        cost_estimate=cost,
    )(x, w1p, b1p, w2p, b2p)

    # Keep the module's [B, 30] contract; under jit this slice fuses into the
    # consumer.  If a downstream op can consume the [B, 128] lane-padded
    # buffer directly (valid cols 0:30), drop this slice to save HBM traffic.
    return out_padded[:, :OUT_DIM]


def init_params(key):
    # Deterministic synthetic init, mirroring nn.Linear's U(-1/sqrt(fan_in), .)
    k1, k2, k3, k4 = jax.random.split(key, 4)
    lim1 = 1.0 / jnp.sqrt(IN_DIM)
    lim2 = 1.0 / jnp.sqrt(HID_DIM)
    w1 = jax.random.uniform(k1, (IN_DIM, HID_DIM), jnp.float32, -lim1, lim1)
    b1 = jax.random.uniform(k2, (1, HID_DIM), jnp.float32, -lim1, lim1)
    w2 = jax.random.uniform(k3, (HID_DIM, OUT_DIM), jnp.float32, -lim2, lim2)
    b2 = jax.random.uniform(k4, (1, OUT_DIM), jnp.float32, -lim2, lim2)
    return w1, b1, w2, b2


# TODO(synk): the module's train()/MSELoss/SGD step is host-side training
# machinery, not part of the forward pass; only forward() is implemented here.

if __name__ == "__main__":
    key = jax.random.PRNGKey(0)
    kx, kp = jax.random.split(key)

    w1, b1, w2, b2 = init_params(kp)
    fwd = jax.jit(mlp_forward)

    # --- f32 path: exact match to the reference (exercises exact-fit and
    #     ragged-last-block tilings). ---
    params_f32 = pad_params(w1, b1, w2, b2)
    for B in (8, 20):
        x = jax.random.normal(jax.random.fold_in(kx, B), (B, IN_DIM), jnp.float32)
        out = fwd(x, *params_f32)
        jax.block_until_ready(out)
        ref = jax.nn.sigmoid(jax.nn.sigmoid(x @ w1 + b1) @ w2 + b2)
        assert out.shape == (B, OUT_DIM)
        assert jnp.allclose(out, ref, atol=1e-5, rtol=1e-5)

    # --- bf16-input path (v6e/v7x MXU-native, halved x traffic); numerics
    #     loosened vs the f32 reference accordingly. ---
    params_bf16 = pad_params(w1, b1, w2, b2, dtype=jnp.bfloat16)
    xb = jax.random.normal(kx, (16, IN_DIM), jnp.float32)
    out_bf16 = fwd(xb, *params_bf16)
    jax.block_until_ready(out_bf16)
    ref_b = jax.nn.sigmoid(jax.nn.sigmoid(xb @ w1 + b1) @ w2 + b2)
    assert out_bf16.shape == (16, OUT_DIM)
    assert jnp.allclose(out_bf16, ref_b, atol=2e-2, rtol=2e-2)

    print("KERNEL_OK")
</pallas_src>

<mosaic_0001>
module attributes {stable_mosaic.version = 11 : i64} {
  func.func @mlp_kernel(%arg0: i32, %arg1: memref<8x400xf32, #tpu.memory_space<vmem>>, %arg2: memref<400x128xf32, #tpu.memory_space<vmem>>, %arg3: memref<1x128xf32, #tpu.memory_space<vmem>>, %arg4: memref<128x128xf32, #tpu.memory_space<vmem>>, %arg5: memref<1x128xf32, #tpu.memory_space<vmem>>, %arg6: memref<8x128xf32, #tpu.memory_space<vmem>>) attributes {dimension_semantics = [#tpu.dimension_semantics<parallel>], iteration_bounds = array<i64: 1>, scalar_prefetch = 0 : i64, scratch_operands = 0 : i64, tpu.core_type = #tpu.core_type<tc>, window_params = [{transform_indices = @transform_0, window_bounds = array<i64: 8, 400>}, {pipeline_mode = #tpu.pipeline_mode<synchronous>, transform_indices = @transform_1, window_bounds = array<i64: 400, 128>}, {pipeline_mode = #tpu.pipeline_mode<synchronous>, transform_indices = @transform_2, window_bounds = array<i64: 1, 128>}, {pipeline_mode = #tpu.pipeline_mode<synchronous>, transform_indices = @transform_3, window_bounds = array<i64: 128, 128>}, {pipeline_mode = #tpu.pipeline_mode<synchronous>, transform_indices = @transform_4, window_bounds = array<i64: 1, 128>}, {transform_indices = @transform_5, window_bounds = array<i64: 8, 128>}]} {
    %c0 = arith.constant 0 : index
    %c0_0 = arith.constant 0 : index
    %0 = vector.load %arg1[%c0, %c0_0] : memref<8x400xf32, #tpu.memory_space<vmem>>, vector<8x400xf32>
    %c0_1 = arith.constant 0 : index
    %c0_2 = arith.constant 0 : index
    %1 = vector.load %arg2[%c0_1, %c0_2] : memref<400x128xf32, #tpu.memory_space<vmem>>, vector<400x128xf32>
    %cst = arith.constant dense<0.000000e+00> : vector<8x128xf32>
    %2 = tpu.matmul %0, %1, %cst {dimension_numbers = #tpu.dot_dimension_numbers<[1], [0], [0], [1], [0, 0, 1, 1], [], []>} : vector<8x400xf32>, vector<400x128xf32>, vector<8x128xf32> -> vector<8x128xf32>
    %c0_3 = arith.constant 0 : index
    %c0_4 = arith.constant 0 : index
    %3 = vector.load %arg3[%c0_3, %c0_4] : memref<1x128xf32, #tpu.memory_space<vmem>>, vector<1x128xf32>
    %4 = vector.broadcast %3 : vector<1x128xf32> to vector<8x128xf32>
    %5 = arith.addf %2, %4 : vector<8x128xf32>
    %6 = arith.negf %5 : vector<8x128xf32>
    %7 = math.exp %6 : vector<8x128xf32>
    %cst_5 = arith.constant 1.000000e+00 : f32
    %8 = vector.broadcast %cst_5 : f32 to vector<8x128xf32>
    %9 = arith.addf %8, %7 : vector<8x128xf32>
    %10 = arith.divf %8, %9 : vector<8x128xf32>
    %c0_6 = arith.constant 0 : index
    %c0_7 = arith.constant 0 : index
    %11 = vector.load %arg4[%c0_6, %c0_7] : memref<128x128xf32, #tpu.memory_space<vmem>>, vector<128x128xf32>
    %cst_8 = arith.constant dense<0.000000e+00> : vector<8x128xf32>
    %12 = tpu.matmul %10, %11, %cst_8 {dimension_numbers = #tpu.dot_dimension_numbers<[1], [0], [0], [1], [0, 0, 1, 1], [], []>} : vector<8x128xf32>, vector<128x128xf32>, vector<8x128xf32> -> vector<8x128xf32>
    %c0_9 = arith.constant 0 : index
    %c0_10 = arith.constant 0 : index
    %13 = vector.load %arg5[%c0_9, %c0_10] : memref<1x128xf32, #tpu.memory_space<vmem>>, vector<1x128xf32>
    %14 = vector.broadcast %13 : vector<1x128xf32> to vector<8x128xf32>
    %15 = arith.addf %12, %14 : vector<8x128xf32>
    %16 = arith.negf %15 : vector<8x128xf32>
    %17 = math.exp %16 : vector<8x128xf32>
    %cst_11 = arith.constant 1.000000e+00 : f32
    %18 = vector.broadcast %cst_11 : f32 to vector<8x128xf32>
    %19 = arith.addf %18, %17 : vector<8x128xf32>
    %20 = arith.divf %18, %19 : vector<8x128xf32>
    %c0_12 = arith.constant 0 : index
    %c0_13 = arith.constant 0 : index
    %21 = vector.load %arg6[%c0_12, %c0_13] : memref<8x128xf32, #tpu.memory_space<vmem>>, vector<8x128xf32>
    tpu.vector_store %arg6[%c0_12, %c0_13], %20 {strides = array<i32>} : memref<8x128xf32, #tpu.memory_space<vmem>>, vector<8x128xf32>,
    return
  }
  func.func @transform_0(%arg0: i32) -> (i32, i32) {
    %c0_i32 = arith.constant 0 : i32
    %c0_i32_0 = arith.constant 0 : i32
    return %arg0, %c0_i32 : i32, i32
  }
  func.func @transform_1(%arg0: i32) -> (i32, i32) {
    %c0_i32 = arith.constant 0 : i32
    %c0_i32_0 = arith.constant 0 : i32
    %c0_i32_1 = arith.constant 0 : i32
    return %c0_i32, %c0_i32_0 : i32, i32
  }
  func.func @transform_2(%arg0: i32) -> (i32, i32) {
    %c0_i32 = arith.constant 0 : i32
    %c0_i32_0 = arith.constant 0 : i32
    %c0_i32_1 = arith.constant 0 : i32
    return %c0_i32, %c0_i32_0 : i32, i32
  }
  func.func @transform_3(%arg0: i32) -> (i32, i32) {
    %c0_i32 = arith.constant 0 : i32
    %c0_i32_0 = arith.constant 0 : i32
    %c0_i32_1 = arith.constant 0 : i32
    return %c0_i32, %c0_i32_0 : i32, i32
  }
  func.func @transform_4(%arg0: i32) -> (i32, i32) {
    %c0_i32 = arith.constant 0 : i32
    %c0_i32_0 = arith.constant 0 : i32
    %c0_i32_1 = arith.constant 0 : i32
    return %c0_i32, %c0_i32_0 : i32, i32
  }
  func.func @transform_5(%arg0: i32) -> (i32, i32) {
    %c0_i32 = arith.constant 0 : i32
    %c0_i32_0 = arith.constant 0 : i32
    return %arg0, %c0_i32 : i32, i32
  }
}

</mosaic_0001>

<bundles_post_ra>
// kernel: mlp_forward.1
= control target key start
LH: loop header
LB: loop body
LE: loop exit
PB: predicated region body
PF: predicated region fallthrough
CT: control target
= control target key end

     0   :  { %10 = vsyncpa [#allocation3], 0  ;;  %s672_s0 = inlined_call_operand.hbm [shape: f32[8,400], index: 0, kind: input, shape index: {}]   ;;  %s673_s1 = inlined_call_operand.hbm [shape: f32[400,128], index: 1, kind: input, shape index: {}]   ;;  %s674_s2 = inlined_call_operand.vmem [shape: f32[1,128], index: 2, kind: input, shape index: {}]   ;;  %s675_s3 = inlined_call_operand.hbm [shape: f32[128,128], index: 3, kind: input, shape index: {}]   ;;  %s676_s4 = inlined_call_operand.vmem [shape: f32[1,128], index: 4, kind: input, shape index: {}]   ;;  %s677_s5 = inlined_call_operand.hbm [shape: f32[8,128], index: 5, kind: output, shape index: {}]  }
   0x1   :  { %11 = vsyncpa [#allocation6], 0 }
   0x2   :  { %12 = vsyncpa [#allocation4], 0  ;;  %s581_s18 = smov [#allocation5]  }
   0x3   :  { %s28_s19 = sshll.u32 %s581_s18, 4  ;;  %s29_s19 = int_to_ptr.vmem [resolvable:$true] %s28_s19 }
   0x4   :  { %s503_s20 = scalar_lea.vmem %s29_s19, 6400  ;;  %p508_p1 = scmp.lt.s32.totalorder %s29_s19, %s29_s19 }
   0x5   :  { %p504_p0 = scmp.ne.s32.totalorder %s29_s19, %s503_s20  ;;  %p509_p2 = scmp.lt.s32.totalorder %s503_s20, %s503_s20 }
   0x7   :  { %p510_p3 = por %p509_p2, %p508_p1 }
   0x9   :  { %p511_p4 = pnand %p510_p3, %p504_p0 }
   0xb   :  { %514 = shalt.err (!%p511_p4)
}
   0xc   :  { %s582_s21 = smov 128   ;;  %s583_s22 = smov 8  }
   0xd   :  { %34 = dma.hbm_to_vmem [thread:$0]  %s673_s1, 6400, %s29_s19, [#allocation6], %s582_s21, %s582_s21, %s583_s22  }
   0xe   :  { %s584_s25 = smov [#allocation2]   ;;  %s585_s27 = smov [#allocation7]  }
   0xf   :  { %s19_s26 = sshll.u32 %s584_s25, 4  ;;  %s42_s28 = sshll.u32 %s585_s27, 4  ;;  %s20_s26 = int_to_ptr.vmem [resolvable:$true] %s19_s26  ;;  %s43_s28 = int_to_ptr.vmem [resolvable:$true] %s42_s28 }
  0x10   :  { %s523_s29 = scalar_lea.vmem %s20_s26, 512  ;;  %p528_p6 = scmp.lt.s32.totalorder %s20_s26, %s20_s26 }
  0x11   :  { %p524_p5 = scmp.ne.s32.totalorder %s20_s26, %s523_s29  ;;  %p529_p7 = scmp.lt.s32.totalorder %s523_s29, %s523_s29 }
  0x13   :  { %p530_p8 = por %p529_p7, %p528_p6 }
  0x15   :  { %p531_p9 = pnand %p530_p8, %p524_p5 }
  0x17   :  { %534 = shalt.err (!%p531_p9)
}
  0x18   :  { %22 = dma.hbm_to_vmem [thread:$0]  %s672_s0, 512, %s20_s26, [#allocation3]  }
  0x19   :  { %s543_s7 = scalar_lea.vmem %s43_s28, 2048  ;;  %p548_p11 = scmp.lt.s32.totalorder %s43_s28, %s43_s28 }
  0x1a   :  { %p544_p10 = scmp.ne.s32.totalorder %s43_s28, %s543_s7  ;;  %p549_p12 = scmp.lt.s32.totalorder %s543_s7, %s543_s7 }
  0x1c   :  { %p550_p13 = por %p549_p12, %p548_p11 }
  0x1e   :  { %p551_p0 = pnand %p550_p13, %p544_p10 }
  0x20   :  { %554 = shalt.err (!%p551_p0)
}
  0x21   :  { %48 = dma.hbm_to_vmem [thread:$0]  %s675_s3, 2048, %s43_s28, [#allocation6], %s582_s21, %s582_s21, %s583_s22  }
  0x22   :  { %575 = dma.done.wait [#allocation3], 512  }
  0x23   :  { %576 = vsyncadd [#allocation3], 4294966784 }
  0x24   :  { %577 = dma.done.wait [#allocation6], 8448  }
  0x25   :  { %578 = vsyncadd [#allocation6], 4294958848  ;;  %v586_v0 = vmov 0.0   ;;  %v95_v1 = vld [vmem:[#allocation5 + $0xf8] sm:$0xff]  ;;  %v94_v4 = vld [vmem:[#allocation5 + $0xf0] sm:$0xff]  ;;  %vm121_vm0 = vcmask 130048  }
  0x26   :  { %195 = vmatprep.subr.mxu1 %v586_v0  ;;  %v79_v2 = vld [vmem:[#allocation5 + $0x78] sm:$0xff]  ;;  %392 = vmatprep.subr.mxu0 %v95_v1  ;;  %v78_v5 = vld [vmem:[#allocation5 + $0x70] sm:$0xff]  ;;  %v93_v7 = vld [vmem:[#allocation5 + $0xe8] sm:$0xff]  ;;  %vm587_vm1 = vmmov 0  }
  0x27   :  { %v111_v3 = vld [vmem:[#allocation5 + $0x178] sm:$0xff]  ;;  %v110_v6 = vld [vmem:[#allocation5 + $0x170] sm:$0xff]  ;;  %393 = vmatpush3.msra.mxu0 %v79_v2  ;;  %v109_v8 = vld [vmem:[#allocation5 + $0x168] sm:$0xff] }
  0x28   :  { %196 = vmatpush1.msra.mxu1 %v111_v3  ;;  %394 = vmatprep.subr.mxu0 %v94_v4  ;;  %v77_v9 = vld [vmem:[#allocation5 + $0x68] sm:$0xff]  ;;  %v92_v10 = vld [vmem:[#allocation5 + $0xe0] sm:$0xff]  ;;  %v91_v13 = vld [vmem:[#allocation5 + $0xd8] sm:$0xff] }
  0x29   :  { %197 = vmatprep.subr.mxu1 %v586_v0  ;;  %395 = vmatpush3.msra.mxu0 %v78_v5  ;;  %v108_v11 = vld [vmem:[#allocation5 + $0x160] sm:$0xff]  ;;  %v107_v14 = vld [vmem:[#allocation5 + $0x158] sm:$0xff]  ;;  %v90_v16 = vld [vmem:[#allocation5 + $0xd0] sm:$0xff] }
  0x2a   :  { %198 = vmatpush1.msra.mxu1 %v110_v6  ;;  %396 = vmatprep.subr.mxu0 %v93_v7  ;;  %v76_v12 = vld [vmem:[#allocation5 + $0x60] sm:$0xff]  ;;  %v75_v15 = vld [vmem:[#allocation5 + $0x58] sm:$0xff]  ;;  %v106_v17 = vld [vmem:[#allocation5 + $0x150] sm:$0xff] }
  0x2b   :  { %199 = vmatprep.subr.mxu1 %v586_v0  ;;  %397 = vmatpush3.msra.mxu0 %v77_v9  ;;  %v74_v18 = vld [vmem:[#allocation5 + $0x50] sm:$0xff]  ;;  %v89_v19 = vld [vmem:[#allocation5 + $0xc8] sm:$0xff]  ;;  %v88_v22 = vld [vmem:[#allocation5 + $0xc0] sm:$0xff] }
  0x2c   :  { %200 = vmatpush1.msra.mxu1 %v109_v8  ;;  %398 = vmatprep.subr.mxu0 %v92_v10  ;;  %v105_v20 = vld [vmem:[#allocation5 + $0x148] sm:$0xff]  ;;  %v104_v23 = vld [vmem:[#allocation5 + $0x140] sm:$0xff]  ;;  %v87_v25 = vld [vmem:[#allocation5 + $0xb8] sm:$0xff] }
  0x2d   :  { %201 = vmatprep.subr.mxu1 %v586_v0  ;;  %399 = vmatpush3.msra.mxu0 %v76_v12  ;;  %v73_v21 = vld [vmem:[#allocation5 + $0x48] sm:$0xff]  ;;  %v72_v24 = vld [vmem:[#allocation5 + $0x40] sm:$0xff]  ;;  %v103_v26 = vld [vmem:[#allocation5 + $0x138] sm:$0xff] }
  0x2e   :  { %202 = vmatpush1.msra.mxu1 %v108_v11  ;;  %400 = vmatprep.subr.mxu0 %v91_v13  ;;  %v71_v27 = vld [vmem:[#allocation5 + $0x38] sm:$0xff]  ;;  %v86_v28 = vld [vmem:[#allocation5 + $0xb0] sm:$0xff]  ;;  %v85_v31 = vld [vmem:[#allocation5 + $0xa8] sm:$0xff] }
  0x2f   :  { %203 = vmatprep.subr.mxu1 %v586_v0  ;;  %401 = vmatpush3.msra.mxu0 %v75_v15  ;;  %v102_v29 = vld [vmem:[#allocation5 + $0x130] sm:$0xff]  ;;  %v101_v32 = vld [vmem:[#allocation5 + $0x128] sm:$0xff]  ;;  %v84_v34 = vld [vmem:[#allocation5 + $0xa0] sm:$0xff] }
  0x30   :  { %204 = vmatpush1.msra.mxu1 %v107_v14  ;;  %402 = vmatprep.subr.mxu0 %v90_v16  ;;  %v70_v30 = vld [vmem:[#allocation5 + $0x30] sm:$0xff]  ;;  %v69_v33 = vld [vmem:[#allocation5 + $0x28] sm:$0xff]  ;;  %v100_v35 = vld [vmem:[#allocation5 + $0x120] sm:$0xff] }
  0x31   :  { %205 = vmatprep.subr.mxu1 %v586_v0  ;;  %403 = vmatpush3.msra.mxu0 %v74_v18  ;;  %v68_v36 = vld [vmem:[#allocation5 + $0x20] sm:$0xff]  ;;  %v83_v37 = vld [vmem:[#allocation5 + $0x98] sm:$0xff]  ;;  %v82_v40 = vld [vmem:[#allocation5 + $0x90] sm:$0xff] }
  0x32   :  { %206 = vmatpush1.msra.mxu1 %v106_v17  ;;  %404 = vmatprep.subr.mxu0 %v89_v19  ;;  %v99_v38 = vld [vmem:[#allocation5 + $0x118] sm:$0xff]  ;;  %v98_v41 = vld [vmem:[#allocation5 + $0x110] sm:$0xff]  ;;  %v81_v43 = vld [vmem:[#allocation5 + $0x88] sm:$0xff] }
  0x33   :  { %207 = vmatprep.subr.mxu1 %v586_v0  ;;  %405 = vmatpush3.msra.mxu0 %v73_v21  ;;  %v67_v39 = vld [vmem:[#allocation5 + $0x18] sm:$0xff]  ;;  %v66_v42 = vld [vmem:[#allocation5 + $0x10] sm:$0xff]  ;;  %v97_v44 = vld [vmem:[#allocation5 + $0x108] sm:$0xff] }
  0x34   :  { %208 = vmatpush1.msra.mxu1 %v105_v20  ;;  %406 = vmatprep.subr.mxu0 %v88_v22  ;;  %v65_v45 = vld [vmem:[#allocation5 + $0x8] sm:$0xff]  ;;  %v80_v46 = vld [vmem:[#allocation5 + $0x80] sm:$0xff]  ;;  %v63_v52 = vld [vmem:[#allocation2 + $0x18] sm:$0xff] }
  0x35   :  { %209 = vmatprep.subr.mxu1 %v586_v0  ;;  %407 = vmatpush3.msra.mxu0 %v72_v24  ;;  %v61_v47 = vld [vmem:[#allocation2 + $0x8] sm:$0xff]  ;;  %v64_v48 = vld [vmem:[#allocation5] sm:$0xff]  ;;  %v62_v54 = vld [vmem:[#allocation2 + $0x10] sm:$0xff] }
  0x36   :  { %210 = vmatpush1.msra.mxu1 %v104_v23  ;;  %408 = vmatprep.subr.mxu0 %v87_v25  ;;  %v96_v49 = vld [vmem:[#allocation5 + $0x100] sm:$0xff]  ;;  %v113_v51 = vld [vmem:[#allocation5 + $0x188] sm:$0xff]  ;;  %v284_v57 = vld [vmem:[#allocation7 + $0x68] sm:$0xff] }
  0x37   :  { %211 = vmatprep.subr.mxu1 %v586_v0  ;;  %409 = vmatpush3.msra.mxu0 %v71_v27  ;;  %v60_v50 = vld [vmem:[#allocation2] sm:$0xff]  ;;  %v286_v55 = vld [vmem:[#allocation7 + $0x78] sm:$0xff]  ;;  %v283_v58 = vld [vmem:[#allocation7 + $0x60] sm:$0xff] }
  0x38   :  { %212 = vmatpush1.msra.mxu1 %v103_v26  ;;  %410 = vmatprep.subr.mxu0 %v86_v28  ;;  %v112_v53 = vld [vmem:[#allocation5 + $0x180] sm:$0xff]  ;;  %v282_v59 = vld [vmem:[#allocation7 + $0x58] sm:$0xff]  ;;  %v280_v61 = vld [vmem:[#allocation7 + $0x48] sm:$0xff] }
  0x39   :  { %213 = vmatprep.subr.mxu1 %v586_v0  ;;  %411 = vmatpush3.msra.mxu0 %v70_v30  ;;  %v285_v56 = vld [vmem:[#allocation7 + $0x70] sm:$0xff]  ;;  %v279_v62 = vld [vmem:[#allocation7 + $0x40] sm:$0xff]  ;;  %v278_v63 = vld [vmem:[#allocation7 + $0x38] sm:$0xff] }
  0x3a   :  { %214 = vmatpush1.msra.mxu1 %v102_v29  ;;  %412 = vmatprep.subr.mxu0 %v85_v31  ;;  %v281_v60 = vld [vmem:[#allocation7 + $0x50] sm:$0xff]  ;;  %v276_v2 = vld [vmem:[#allocation7 + $0x28] sm:$0xff]  ;;  %v275_v3 = vld [vmem:[#allocation7 + $0x20] sm:$0xff] }
  0x3b   :  { %215 = vmatprep.subr.mxu1 %v586_v0  ;;  %413 = vmatpush3.msra.mxu0 %v69_v33  ;;  %v277_v1 = vld [vmem:[#allocation7 + $0x30] sm:$0xff]  ;;  %v274_v4 = vld [vmem:[#allocation7 + $0x18] sm:$0xff]  ;;  %v272_v6 = vld [vmem:[#allocation7 + $0x8] sm:$0xff] }
  0x3c   :  { %216 = vmatpush1.msra.mxu1 %v101_v32  ;;  %414 = vmatprep.subr.mxu0 %v84_v34  ;;  %v273_v5 = vld [vmem:[#allocation7 + $0x10] sm:$0xff]  ;;  %v271_v7 = vld [vmem:[#allocation7] sm:$0xff] }
  0x3d   :  { %217 = vmatprep.subr.mxu1 %v586_v0  ;;  %415 = vmatpush3.msra.mxu0 %v68_v36  ;;  %v387_v10 = vld [vmem:[%s674_s2] ss:$0 sm:$0xff]  ;;  %s588_s2 = smov [#allocation8]  }
  0x3e   :  { %218 = vmatpush1.msra.mxu1 %v100_v35  ;;  %416 = vmatprep.subr.mxu0 %v83_v37  ;;  %s377_s11 = sshll.u32 %s588_s2, 4  ;;  %s378_s11 = int_to_ptr.vmem [resolvable:$true] %s377_s11 }
  0x3f   :  { %219 = vmatprep.subr.mxu1 %v586_v0  ;;  %417 = vmatpush3.msra.mxu0 %v67_v39  ;;  %s555_s12 = scalar_lea.vmem %s378_s11, 128  ;;  %p560_p2 = scmp.lt.s32.totalorder %s378_s11, %s378_s11 }
  0x40   :  { %220 = vmatpush1.msra.mxu1 %v99_v38  ;;  %418 = vmatprep.subr.mxu0 %v82_v40  ;;  %p556_p1 = scmp.ne.s32.totalorder %s378_s11, %s555_s12  ;;  %p561_p3 = scmp.lt.s32.totalorder %s555_s12, %s555_s12 }
  0x41   :  { %221 = vmatprep.subr.mxu1 %v586_v0  ;;  %419 = vmatpush3.msra.mxu0 %v66_v42 }
  0x42   :  { %222 = vmatpush1.msra.mxu1 %v98_v41  ;;  %420 = vmatprep.subr.mxu0 %v81_v43  ;;  %p562_p4 = por %p561_p3, %p560_p2 }
  0x43   :  { %223 = vmatprep.subr.mxu1 %v586_v0  ;;  %421 = vmatpush3.msra.mxu0 %v65_v45 }
  0x44   :  { %224 = vmatpush1.msra.mxu1 %v97_v44  ;;  %422 = vmatprep.subr.mxu0 %v80_v46  ;;  %p563_p5 = pnand %p562_p4, %p556_p1 }
  0x45   :  { %225 = vmatprep.subr.mxu1 %v586_v0  ;;  %189 = vmatprep.mubr.f32.mxu0 %v61_v47 }
  0x46   :  { %423 = vmatpush3.msra.mxu0 %v64_v48  ;;  %226 = vmatpush1.msra.mxu1 %v96_v49 }
  0x47   :  { %190 = vmatmul.mubr.f32.vlgmr.msra.gmra.mxu0 %v60_v50  ;;  %255 = vmatprep.subr.mxu1 %v586_v0 }
  0x48   :  { %256 = vmatpush2.msra.mxu1 %v113_v51  ;;  %388 = vmatprep.mubr.msk.f32.mxu1 %vm121_vm0, %v63_v52 }
  0x49   :  { %257 = vmatprep.subr.mxu1 %v586_v0  ;;  %444 = vmatprep.subr.mxu0 %v586_v0 }
  0x4a   :  { %258 = vmatpush2.msra.mxu1 %v112_v53  ;;  %445 = vmatpush3.msra.mxu0 %v286_v55 }
  0x4b   :  { %260 = vmatmul.mubr.f32.vlgmr.msra.gmra.mxu1 %v62_v54  ;;  %446 = vmatprep.subr.mxu0 %v586_v0 }
  0x4c   :  { %447 = vmatpush3.msra.mxu0 %v285_v56  ;;  %476 = vmatprep.mubr.msk.f32.mxu0 %vm587_vm1, %v586_v0 }
  0x4d   :  { %448 = vmatprep.subr.mxu0 %v586_v0 }
  0x4e   :  { %449 = vmatpush3.msra.mxu0 %v284_v57 }
  0x4f   :  { %450 = vmatprep.subr.mxu0 %v586_v0 }
  0x50   :  { %451 = vmatpush3.msra.mxu0 %v283_v58 }
  0x51   :  { %452 = vmatprep.subr.mxu0 %v586_v0 }
  0x52   :  { %453 = vmatpush3.msra.mxu0 %v282_v59 }
  0x53   :  { %454 = vmatprep.subr.mxu0 %v586_v0 }
  0x54   :  { %455 = vmatpush3.msra.mxu0 %v281_v60 }
  0x55   :  { %456 = vmatprep.subr.mxu0 %v586_v0 }
  0x56   :  { %457 = vmatpush3.msra.mxu0 %v280_v61 }
  0x57   :  { %458 = vmatprep.subr.mxu0 %v586_v0 }
  0x58   :  { %459 = vmatpush3.msra.mxu0 %v279_v62 }
  0x59   :  { %460 = vmatprep.subr.mxu0 %v586_v0 }
  0x5a   :  { %461 = vmatpush3.msra.mxu0 %v278_v63 }
  0x5b   :  { %462 = vmatprep.subr.mxu0 %v586_v0 }
  0x5c   :  { %463 = vmatpush3.msra.mxu0 %v277_v1 }
  0x5d   :  { %464 = vmatprep.subr.mxu0 %v586_v0 }
  0x5e   :  { %465 = vmatpush3.msra.mxu0 %v276_v2 }
  0x5f   :  { %466 = vmatprep.subr.mxu0 %v586_v0 }
  0x60   :  { %467 = vmatpush3.msra.mxu0 %v275_v3 }
  0x61   :  { %468 = vmatprep.subr.mxu0 %v586_v0 }
  0x62   :  { %469 = vmatpush3.msra.mxu0 %v274_v4 }
  0x63   :  { %470 = vmatprep.subr.mxu0 %v586_v0 }
  0x64   :  { %471 = vmatpush3.msra.mxu0 %v273_v5 }
  0x65   :  { %472 = vmatprep.subr.mxu0 %v586_v0 }
  0x66   :  { %473 = vmatpush3.msra.mxu0 %v272_v6 }
  0x67   :  { %474 = vmatprep.subr.mxu0 %v586_v0  ;;  %v390_v0 = vld [vmem:[%s676_s4] ss:$0 sm:$0xff] }
  0x68   :  { %475 = vmatpush3.msra.mxu0 %v271_v7 }
 0x107   :  { %v424_v8 = vpop.f32.mrf.mxu0 }
 0x109   :  { %v425_v9 = vpop.f32.mrf.mxu0 }
 0x10a   :  { %v426_v11 = vadd.f32 %v425_v9, %v424_v8 }
 0x10b   :  { %v261_v12 = vpop.f32.mrf.mxu1 }
 0x10c   :  { %v192_v13 = vadd.f32 %v426_v11, %v387_v10 }
 0x10d   :  { %v263_v14 = vpop.f32.mrf.mxu1 }
 0x10e   :  { %v262_v15 = vadd.f32 %v261_v12, %v192_v13 }
 0x110   :  { %v389_v16 = vmul.f32 -1.442695, %v262_v15 }
 0x112   :  { %487 = vpow2.f32 %v389_v16 }
 0x11f   :  { %v488_v17 = vpop.eup %487 }
 0x120   :  { %v268_v18 = vadd.f32 1.0, %v488_v17 }
 0x122   :  { %489 = vrcp.f32 %v268_v18 }
 0x12f   :  { %v490_v19 = vpop.eup %489 }
 0x130   :  { %477 = vmatmul.mubr.f32.vlgmr.msra.gmra.mxu0 %v490_v19 }
 0x1f0   :  { %v360_v20 = vpop.f32.mrf.mxu0 }
 0x1f1   :  { %v361_v21 = vadd.f32 %v390_v0, %v360_v20 }
 0x1f2   :  { %v478_v22 = vpop.f32.mrf.mxu0 }
 0x1f3   :  { %v391_v23 = vmul.f32 -1.442695, %v361_v21 }
 0x1f5   :  { %491 = vpow2.f32 %v391_v23 }
 0x202   :  { %v492_v24 = vpop.eup %491 }
 0x203   :  { %v367_v25 = vadd.f32 1.0, %v492_v24 }
 0x205   :  { %493 = vrcp.f32 %v367_v25 }
 0x212   :  { %v494_v26 = vpop.eup %493 }
 0x213   :  { %370 = vst [vmem:[#allocation8] sm:$0xff] %v494_v26 }
 0x214   :  { %566 = shalt.err (!%p563_p5)
}
 0x215   :  { %380 = dma.vmem_to_hbm [thread:$0]  %s378_s11, 128, %s677_s5, [#allocation4]  }
 0x216   :  { %579 = dma.done.wait [#allocation4], 128  }
 0x217   :  { %580 = vsyncadd [#allocation4], 4294967168 }
 0x218   :  { %384 = vsyncpa [#allocation3], 1 }
 0x219   :  { %385 = vsyncpa [#allocation6], 1 }
 0x21a   :  { %386 = vsyncpa [#allocation4], 1 }

</bundles_post_ra>
